<compile_context>
chip_gen: v6e
topology: v6e:2x2x1
jax: 0.10.0
libtpu: 0.0.40
codegen_flags: <defaults>
</compile_context>

<pallas_src>
import numpy as np
import jax
import jax.numpy as jnp
from jax.experimental import pallas as pl
from jax.experimental.pallas import tpu as pltpu


_NEG_BIG = jnp.float32(-1e30)  # padded-class bias: exp(-1e30 - max) underflows to 0.0 exactly


# ----------------------------- Pallas kernel -----------------------------

def _dalabeller_kernel(x_ref, w_ref, b_ref, o_ref):
    """Fused linear + log-softmax over the lane (class) axis.

    x_ref: (TM, H)      bf16 row tile of the flattened utt_output
    w_ref: (H, A_pad)   bf16 weight^T, padded to a lane-dense class dim (VMEM-resident)
    b_ref: (1, A_pad)   f32 bias, padded columns = -1e30 (VMEM-resident)
    o_ref: (TM, A_pad)  f32 log-probabilities (padded columns ~ -1e30, sliced off later)
    """
    # MXU matmul in bf16 with f32 accumulation; bias add + softmax chain in f32.
    logits = jnp.dot(x_ref[...], w_ref[...],
                     preferred_element_type=jnp.float32) + b_ref[...]
    m = jnp.max(logits, axis=-1, keepdims=True)          # XLU lane reduce
    e = jnp.exp(logits - m)                               # EUP; padded lanes -> 0.0
    s = jnp.sum(e, axis=-1, keepdims=True)                # XLU lane reduce
    o_ref[...] = (logits - m - jnp.log(s)).astype(o_ref.dtype)


# ----------------------------- helpers -----------------------------

def _round_up(x, m):
    return ((x + m - 1) // m) * m


def _pick_row_tile(M, H, A_pad):
    """Largest row tile <= 1024 that fits a conservative VMEM budget, but at
    least 2 tiles so dimension_semantics=("parallel",) can use both v7x TCs."""
    TM = max(8, min(1024, _round_up(pl.cdiv(M, 2), 8)))

    def vmem_bytes(tm):
        # double-buffered x tile (bf16) + double-buffered out tile (f32)
        # + resident W^T (bf16) + resident bias (f32)
        return 2 * tm * H * 2 + 2 * tm * A_pad * 4 + H * A_pad * 2 + 2 * A_pad * 4

    budget = 12 * 1024 * 1024  # stay under v5e's 16 MiB scoped-VMEM default
    while TM > 8 and vmem_bytes(TM) > budget:
        TM = _round_up(max(8, TM // 2), 8)
    return TM


# ----------------------------- parameter prep (once) -----------------------------

def prepare_da_labeller_params(weight, bias):
    """Hoisted out of the per-call path: W^T padded to a lane-dense class dim
    in bf16, bias padded with -1e30 in f32. Call once at parameter-prep time."""
    A, H = weight.shape
    A_pad = _round_up(max(A, 1), 128)
    w_p = jnp.pad(jnp.transpose(weight).astype(jnp.bfloat16),
                  ((0, 0), (0, A_pad - A)))                              # (H, A_pad) bf16
    b_p = jnp.pad(bias.astype(jnp.float32), (0, A_pad - A),
                  constant_values=_NEG_BIG).reshape(1, A_pad)            # (1, A_pad) f32
    return w_p, b_p, A


# ----------------------------- forward -----------------------------

def da_labeller_forward(utt_output, w_p, b_p, num_da_acts):
    """log_softmax(utt_output @ W.T + b, axis=-1) via one Pallas call.

    utt_output: (..., H) float
    w_p:        (H, A_pad) bf16   (from prepare_da_labeller_params)
    b_p:        (1, A_pad) f32    (padded cols = -1e30)
    returns:    (..., num_da_acts) float32 log-probabilities
    """
    orig_shape = utt_output.shape
    H = orig_shape[-1]
    A_pad = w_p.shape[1]
    A = num_da_acts

    # bf16 feed for the dominant x stream (fuses with the producer under jit).
    x = utt_output.reshape(-1, H).astype(jnp.bfloat16)
    M = x.shape[0]

    TM = _pick_row_tile(M, H, A_pad)
    grid_m = pl.cdiv(M, TM)  # ragged last tile handled by Pallas; no jnp.pad of x

    cost = pl.CostEstimate(
        flops=2 * M * H * A_pad,
        transcendentals=M * A_pad,                     # exp
        bytes_accessed=M * H * 2 + H * A_pad * 2 + A_pad * 4 + M * A_pad * 4,
    )

    out = pl.pallas_call(
        _dalabeller_kernel,
        out_shape=jax.ShapeDtypeStruct((M, A_pad), jnp.float32),
        grid_spec=pltpu.PrefetchScalarGridSpec(
            num_scalar_prefetch=0,
            grid=(grid_m,),
            in_specs=[
                pl.BlockSpec((TM, H), lambda i: (i, 0)),        # row tile of x (bf16)
                pl.BlockSpec((H, A_pad), lambda i: (0, 0)),     # W^T   (VMEM-resident)
                pl.BlockSpec((1, A_pad), lambda i: (0, 0)),     # bias  (VMEM-resident)
            ],
            out_specs=pl.BlockSpec((TM, A_pad), lambda i: (i, 0)),
        ),
        compiler_params=pltpu.CompilerParams(
            dimension_semantics=("parallel",)),                 # independent rows (v7x 2-TC)
        cost_estimate=cost,
    )(x, w_p, b_p)

    # Module contract: (..., num_da_acts) log-probabilities.
    # TODO(synk): in training, fuse the downstream NLL/gather into the kernel and
    # skip this lane-padded slab + slice entirely.
    return out[:, :A].reshape(*orig_shape[:-1], A)


# ----------------------------- pure-JAX reference -----------------------------

def _dalabeller_ref(utt_output, weight, bias):
    logits = jnp.einsum("...h,ah->...a", utt_output.astype(jnp.float32),
                        weight.astype(jnp.float32)) + bias.astype(jnp.float32)
    return jax.nn.log_softmax(logits, axis=-1)


# ----------------------------- main -----------------------------

if __name__ == "__main__":
    # Shapes implied by the module: utt_output comes from the hierarchical encoder as
    # (batch, num_utterances, rnn_hidden_size); classes = num_da_acts.
    B, U = 2, 6
    rnn_hidden_size = 32
    num_da_acts = 5

    key = jax.random.PRNGKey(0)
    key, kx, kw, kb = jax.random.split(key, 4)

    utt_output = jax.random.normal(kx, (B, U, rnn_hidden_size), jnp.float32)

    # PyTorch nn.Linear default init: uniform(-1/sqrt(in_features), 1/sqrt(in_features)).
    bound = 1.0 / np.sqrt(rnn_hidden_size)
    weight = jax.random.uniform(kw, (num_da_acts, rnn_hidden_size), jnp.float32, -bound, bound)
    bias = jax.random.uniform(kb, (num_da_acts,), jnp.float32, -bound, bound)

    # Parameter prep happens once (hoisted out of the per-call path).
    w_p, b_p, A = prepare_da_labeller_params(weight, bias)

    got = da_labeller_forward(utt_output, w_p, b_p, A)
    got = jax.block_until_ready(got)

    ref = _dalabeller_ref(utt_output, weight, bias)
    # bf16 matmul inputs -> relaxed tolerance vs. the f32 reference.
    np.testing.assert_allclose(np.asarray(got), np.asarray(ref), atol=2e-2, rtol=2e-2)

    # Log-probabilities should normalize: logsumexp over the class axis == 0.
    lse = jax.scipy.special.logsumexp(got, axis=-1)
    np.testing.assert_allclose(np.asarray(lse), np.zeros_like(np.asarray(lse)), atol=1e-5)

    print("KERNEL_OK")
</pallas_src>

<mosaic_0001>
module attributes {stable_mosaic.version = 11 : i64} {
  func.func @_dalabeller_kernel(%arg0: i32, %arg1: memref<8x32xbf16, #tpu.memory_space<vmem>>, %arg2: memref<32x128xbf16, #tpu.memory_space<vmem>>, %arg3: memref<1x128xf32, #tpu.memory_space<vmem>>, %arg4: memref<8x128xf32, #tpu.memory_space<vmem>>) attributes {dimension_semantics = [#tpu.dimension_semantics<parallel>], iteration_bounds = array<i64: 2>, scalar_prefetch = 0 : i64, scratch_operands = 0 : i64, tpu.core_type = #tpu.core_type<tc>, window_params = [{transform_indices = @transform_0, window_bounds = array<i64: 8, 32>}, {pipeline_mode = #tpu.pipeline_mode<synchronous>, transform_indices = @transform_1, window_bounds = array<i64: 32, 128>}, {pipeline_mode = #tpu.pipeline_mode<synchronous>, transform_indices = @transform_2, window_bounds = array<i64: 1, 128>}, {transform_indices = @transform_3, window_bounds = array<i64: 8, 128>}]} {
    %c0 = arith.constant 0 : index
    %c0_0 = arith.constant 0 : index
    %0 = vector.load %arg1[%c0, %c0_0] : memref<8x32xbf16, #tpu.memory_space<vmem>>, vector<8x32xbf16>
    %c0_1 = arith.constant 0 : index
    %c0_2 = arith.constant 0 : index
    %1 = vector.load %arg2[%c0_1, %c0_2] : memref<32x128xbf16, #tpu.memory_space<vmem>>, vector<32x128xbf16>
    %cst = arith.constant dense<0.000000e+00> : vector<8x128xf32>
    %2 = tpu.matmul %0, %1, %cst {dimension_numbers = #tpu.dot_dimension_numbers<[1], [0], [0], [1], [0, 0, 1, 1], [], []>} : vector<8x32xbf16>, vector<32x128xbf16>, vector<8x128xf32> -> vector<8x128xf32>
    %c0_3 = arith.constant 0 : index
    %c0_4 = arith.constant 0 : index
    %3 = vector.load %arg3[%c0_3, %c0_4] : memref<1x128xf32, #tpu.memory_space<vmem>>, vector<1x128xf32>
    %4 = vector.broadcast %3 : vector<1x128xf32> to vector<8x128xf32>
    %5 = arith.addf %2, %4 : vector<8x128xf32>
    %cst_5 = arith.constant dense<0xFF800000> : vector<8xf32>
    %6 = vector.multi_reduction <maximumf>, %5, %cst_5 [1] : vector<8x128xf32> to vector<8xf32>
    %7 = vector.shape_cast %6 : vector<8xf32> to vector<8x1xf32>
    %8 = vector.broadcast %7 : vector<8x1xf32> to vector<8x128xf32>
    %9 = arith.subf %5, %8 : vector<8x128xf32>
    %10 = math.exp %9 : vector<8x128xf32>
    %cst_6 = arith.constant dense<0.000000e+00> : vector<8xf32>
    %11 = vector.multi_reduction <add>, %10, %cst_6 [1] : vector<8x128xf32> to vector<8xf32>
    %12 = vector.shape_cast %11 : vector<8xf32> to vector<8x1xf32>
    %13 = vector.broadcast %7 : vector<8x1xf32> to vector<8x128xf32>
    %14 = arith.subf %5, %13 : vector<8x128xf32>
    %15 = math.log %12 : vector<8x1xf32>
    %16 = vector.broadcast %15 : vector<8x1xf32> to vector<8x128xf32>
    %17 = arith.subf %14, %16 : vector<8x128xf32>
    %c0_7 = arith.constant 0 : index
    %c0_8 = arith.constant 0 : index
    %18 = vector.load %arg4[%c0_7, %c0_8] : memref<8x128xf32, #tpu.memory_space<vmem>>, vector<8x128xf32>
    tpu.vector_store %arg4[%c0_7, %c0_8], %17 {strides = array<i32>} : memref<8x128xf32, #tpu.memory_space<vmem>>, vector<8x128xf32>,
    return
  }
  func.func @transform_0(%arg0: i32) -> (i32, i32) {
    %c0_i32 = arith.constant 0 : i32
    %c0_i32_0 = arith.constant 0 : i32
    return %arg0, %c0_i32 : i32, i32
  }
  func.func @transform_1(%arg0: i32) -> (i32, i32) {
    %c0_i32 = arith.constant 0 : i32
    %c0_i32_0 = arith.constant 0 : i32
    %c0_i32_1 = arith.constant 0 : i32
    return %c0_i32, %c0_i32_0 : i32, i32
  }
  func.func @transform_2(%arg0: i32) -> (i32, i32) {
    %c0_i32 = arith.constant 0 : i32
    %c0_i32_0 = arith.constant 0 : i32
    %c0_i32_1 = arith.constant 0 : i32
    return %c0_i32, %c0_i32_0 : i32, i32
  }
  func.func @transform_3(%arg0: i32) -> (i32, i32) {
    %c0_i32 = arith.constant 0 : i32
    %c0_i32_0 = arith.constant 0 : i32
    return %arg0, %c0_i32 : i32, i32
  }
}

</mosaic_0001>

<bundles_post_ra>
// kernel: tpu_custom_call.1
= control target key start
LH: loop header
LB: loop body
LE: loop exit
PB: predicated region body
PF: predicated region fallthrough
CT: control target
= control target key end

     0   :  { %8 = vsyncpa [#allocation3], 0  ;;  %s780_s0 = inlined_call_operand.hbm [shape: bf16[12,32], index: 0, kind: input, shape index: {}]   ;;  %s781_s1 = inlined_call_operand.hbm [shape: bf16[32,128], index: 1, kind: input, shape index: {}]   ;;  %s782_s2 = inlined_call_operand.vmem [shape: f32[1,128], index: 2, kind: input, shape index: {}]   ;;  %s783_s3 = inlined_call_operand.hbm [shape: f32[12,128], index: 3, kind: output, shape index: {}]  }
   0x1   :  { %10 = vsyncpa [#allocation3 + $0x1], 0 }
   0x2   :  { %11 = vsyncpa [#allocation6], 0 }
   0x3   :  { %12 = vsyncpa [#allocation4], 0 }
   0x4   :  { %14 = vsyncpa [#allocation4 + $0x1], 0  ;;  %s622_s12 = smov 0   ;;  %s624_s13 = smov 0  }
   0x5   :  { %s626_s14 = smov 0   ;;  %s628_s15 = smov 0  }
   0x6 LB: > { %s643_s16 = sadd.s32 4294967295, %s593_s15   ;;  %s375_s17 = sadd.s32 4294967294, %s593_s15   ;;  %s593_s15 = sphi %s628_s15, %s805_s15   ;;  %s589_s14 = sphi %s626_s14, %s804_s14   ;;  %s585_s13 = sphi %s624_s13, %s803_s13   ;;  %s581_s12 = sphi %s622_s12, %s802_s12  }
   0x7   : > { %p40_p0 = scmp.ne.s32.totalorder %s585_s13, %s581_s12  ;;  %p784_p1 = scmp.eq.s32.totalorder %s643_s16, 0 }
   0x8   : > { %p112_p3 = scmp.eq.s32.totalorder %s375_s17, 1  ;;  %p376_p5 = scmp.ge.s32.totalorder %s593_s15, 1 }
   0x9   : > { %p652_p4 = por %p784_p1, %p40_p0  ;;  %p119_p7 = scmp.lt.s32.totalorder %s593_s15, 3 }
   0xa   : > { %p657_p6 = por %p112_p3, %p40_p0  ;;  %s595_s21 = smov [#allocation5]  }
   0xb   : > { %s788_s18 = scalar_select %p652_p4, 1, 0 }
   0xc   : > { %s789_s19 = scalar_select %p657_p6, 1, 0 }
   0xd   : > { %p662_p8 = pnand %p376_p5, %p119_p7  ;;  %s131_s22 = sshll.u32 %s595_s21, 4  ;;  %s132_s22 = int_to_ptr.vmem [resolvable:$true] %s131_s22 }
   0xe   : > { %s676_s24 = sadd.s32 1, %s593_s15   ;;  %s27_s25 = sadd.s32 1, %s589_s14 }
   0xf   : > { %s790_s20 = scalar_select %p662_p8, 1, 0 }
  0x10   : > { %p412_p9 = pneg %p662_p8  ;;  %s24_s26 = ssub.s32 %s593_s15, %s676_s24 }
  0x11   : > { %s482_s27 = scalar_lea.vmem %s132_s22, 256  ;;  %p490_p5 = scmp.lt.s32.totalorder %s132_s22, %s132_s22 }
  0x12   : > { %p671_p11 = pnand %p412_p9, %p784_p1  ;;  %p483_p13 = scmp.ne.s32.totalorder %s132_s22, %s482_s27 }
  0x13   : > { %p491_p7 = scmp.lt.s32.totalorder %s482_s27, %s482_s27 }
  0x14   : > { %p473_p12 = pneg %p671_p11 }
  0x15   : > { %p492_p10 = por %p491_p7, %p490_p5 }
  0x16   : > { %p485_p0 = pnand %p483_p13, %p473_p12 }
  0x18   : > { %p486_p3 = pneg %p485_p0 }
  0x1a   : > { %p493_p2 = pnand %p492_p10, %p486_p3 }
  0x1c   : > { %496 = shalt.err (!%p493_p2)
}
  0x1d   : > { %s596_s28 = smov 64   ;;  %s597_s29 = smov 4  }
  0x1e   : > { %415 = dma.hbm_to_vmem [thread:$0]  (!%p671_p11), %s781_s1, 256, %s132_s22, [#allocation6], %s596_s28, %s596_s28, %s597_s29  }
  0x1f   : > { %p25_p9 = scmp.eq.s32.totalorder %s24_s26, 0  ;;  %p34_p12 = scmp.ne.s32.totalorder %s589_s14, %s585_s13 }
  0x20   : > { %p35_p10 = scmp.eq.s32.totalorder %s593_s15, 0  ;;  %p425_p2 = scmp.lt.s32.totalorder %s593_s15, 2 }
  0x21   : > { %s693_s5 = scalar_select %p25_p9, %s589_s14, %s27_s25  }
  0x22   : > { %p36_p13 = por %p35_p10, %p34_p12  ;;  %p792_p0 = scmp.eq.s32.totalorder %s643_s16, 1 }
  0x23   : > { %s148_s7 = sand.u32 1, %s589_s14   ;;  %s380_s8 = sshll.u32 %s593_s15, 6 }
  0x24   : > { %p697_p3 = por %p792_p0, %p34_p12  ;;  %s379_s9 = sshll.u32 %s148_s7, 2 }
  0x25   : > { %s706_s17 = scalar_lea.hbm %s780_s0, %s380_s8  ;;  %s152_s21 = scalar_lea.vmem [#allocation2], %s379_s9 }
  0x26   : > { %s793_s6 = scalar_select %p697_p3, 1, 0 }
  0x27   : > { %s159_s22 = sshll.u32 %s152_s21, 4  ;;  %p708_p11 = pnand %p425_p2, %p36_p13  ;;  %s160_s22 = int_to_ptr.vmem [resolvable:$true] %s159_s22 }
  0x28   : > { %s149_s25 = scalar_lea.sflag [#allocation3], %s148_s7  ;;  %s497_s26 = scalar_lea.hbm %s706_s17, 64 }
  0x29   : > { %p498_p5 = scmp.ne.s32.totalorder %s706_s17, %s497_s26  ;;  %p499_p7 = pneg %p708_p11 }
  0x2a   : > { %s502_s29 = scalar_lea.hbm %s780_s0, 128  ;;  %p503_p10 = scmp.lt.s32.totalorder %s706_s17, %s780_s0 }
  0x2b   : > { %p500_p9 = pnand %p499_p7, %p498_p5  ;;  %p504_p2 = scmp.lt.s32.totalorder %s502_s29, %s497_s26 }
  0x2d   : > { %p501_p12 = pneg %p500_p9  ;;  %p505_p13 = por %p504_p2, %p503_p10 }
  0x2f   : > { %p506_p0 = pnand %p505_p13, %p501_p12 }
  0x31   : > { %509 = shalt.err (!%p506_p0)
}
  0x32   : > { %s510_s8 = scalar_lea.vmem %s160_s22, 64  ;;  %s598_s7 = smov [#allocation2]  }
  0x33   : > { %p511_p1 = scmp.ne.s32.totalorder %s160_s22, %s510_s8  ;;  %s515_s9 = sshll.u32 %s598_s7, 4  ;;  %s516_s9 = int_to_ptr.vmem [resolvable:$false] %s515_s9 }
  0x34   : > { %s517_s10 = scalar_lea.vmem %s516_s9, 128  ;;  %p518_p5 = scmp.lt.s32.totalorder %s160_s22, %s516_s9 }
  0x35   : > { %p513_p6 = pnand %p511_p1, %p499_p7  ;;  %p519_p9 = scmp.lt.s32.totalorder %s517_s10, %s510_s8 }
  0x37   : > { %p514_p3 = pneg %p513_p6  ;;  %p520_p4 = por %p519_p9, %p518_p5 }
  0x39   : > { %p521_p8 = pnand %p520_p4, %p514_p3 }
  0x3b   : > { %524 = shalt.err (!%p521_p8)
}
  0x3c   : > { %419 = dma.hbm_to_vmem [thread:$0]  (!%p708_p11), %s706_s17, 64, %s160_s22, %s149_s25  }
  0x3d   : > { %p795_p12 = scmp.ne.s32.totalorder %s790_s20, 0 }
  0x3e   : > { %s729_s11 = sand.u32 (!%p795_p12), 1, %s585_s13   ;;  %p796_p1 = scmp.ne.s32.totalorder (!%p795_p12), %s788_s18, 0 }
  0x3f   : > { %168 = sbr.rel (%p795_p12) target bundleno = 601 (0x259), region = 32  ;;  %s382_s21 = sshll.u32 (!%p795_p12), %s729_s11, 2 }
  0x40   : > { %s171_s26 = scalar_lea.sflag (!%p795_p12), [#allocation3], %s729_s11  ;;  %s174_s27 = scalar_lea.vmem (!%p795_p12), [#allocation2], %s382_s21 }
  0x44   : > { %568 = dma.done.wait (%p796_p1), %s171_s26, 64  }
  0x45   : > { %570 = vsyncadd (%p796_p1), %s171_s26, 4294967232  ;;  %p797_p4 = scmp.eq.s32.totalorder %s643_s16, 0 }
  0x47   : > { %572 = dma.done.wait (%p797_p4), [#allocation6], 256   ;;  %p798_p6 = pmov %p797_p4 }
  0x48   : > { %v599_v0 = vmov 0.0   ;;  %vm600_vm0 = vmmov 0   ;;  %v465_v1 = vld [vmem:[#allocation5 + $0x8] sm:$0xff]   ;;  %v466_v2 = vld [vmem:[#allocation5] sm:$0xff]   ;;  %v202_v3 = vld [vmem:[%s174_s27] sm:$0xf] }
  0x49   : > { %574 = vsyncadd (%p798_p6), [#allocation6], 4294967040  ;;  %396 = vmatprep.subr.bf16.mxu0 %v599_v0  ;;  %400 = vmatprep.mubr.msk.bf16.mxu0 %vm600_vm0, %v599_v0  ;;  %vm226_vm1 = vcmask 261120   ;;  %v385_v4 = vld [vmem:[%s782_s2] ss:$0 sm:$0xff]  ;;  %s384_s17 = sshll.u32 %s729_s11, 3 }
  0x4a   : > { %397 = vmatpush3.bf16.msra.mxu0 %v465_v1  ;;  %s390_s22 = sshll.u32 %s643_s16, 7  ;;  %s200_s23 = scalar_lea.vmem [#allocation7], %s384_s17 }
  0x4b   : > { %398 = vmatprep.subr.bf16.mxu0 %v599_v0  ;;  %s295_s25 = sshll.u32 %s200_s23, 4  ;;  %s293_s30 = scalar_lea.hbm %s783_s3, %s390_s22  ;;  %s296_s25 = int_to_ptr.vmem [resolvable:$true] %s295_s25 }
  0x4c   : > { %s282_s4 = scalar_lea.sflag [#allocation4], %s729_s11  ;;  %s525_s8 = scalar_lea.vmem %s296_s25, 128 }
  0x4d   : > { %p526_p8 = scmp.ne.s32.totalorder %s296_s25, %s525_s8  ;;  %p799_p3 = scmp.ne.s32.totalorder %s793_s6, 0 }
  0x4e   : > { %399 = vmatpush3.bf16.msra.mxu0 %v466_v2  ;;  %s601_s7 = smov [#allocation7]  }
  0x4f   : > { %p527_p11 = pnand %p526_p8, %p799_p3  ;;  %s529_s9 = sshll.u32 %s601_s7, 4  ;;  %s530_s9 = int_to_ptr.vmem [resolvable:$false] %s529_s9 }
  0x50   : > { %s531_s16 = scalar_lea.vmem %s530_s9, 256  ;;  %p532_p10 = scmp.lt.s32.totalorder %s296_s25, %s530_s9 }
  0x51   : > { %401 = vmatmul.mubr.msk.bf16.vlgmr.msra.gmra.mxu0 %vm226_vm1, %v202_v3  ;;  %p528_p7 = pneg %p527_p11  ;;  %p533_p2 = scmp.lt.s32.totalorder %s531_s16, %s525_s8 }
  0x53   : > { %p534_p13 = por %p533_p2, %p532_p10 }
  0x55   : > { %p535_p0 = pnand %p534_p13, %p528_p7 }
 0x111   : > { %v264_v5 = vpop.f32.mrf.mxu0 }
 0x112   : > { %v265_v6 = vadd.f32 %v385_v4, %v264_v5 }
 0x113   : > { %v402_v7 = vpop.f32.mrf.mxu0 }
 0x114   : > { %270 = vmax.xlane.f32.xlu0 %v265_v6 }
 0x115   : > { %v267_v8 = vpop.f32.mrf.mxu0 }
 0x117   : > { %v403_v9 = vpop.f32.mrf.mxu0 }
 0x19d   : > { %v271_v10 = vpop.xlane.xlu0 %270 }
 0x19e   : > { %v272_v11 = vsub.f32 %v265_v6, %v271_v10 }
 0x1a0   : > { %v273_v12 = vmul.f32 1.442695, %v272_v11 }
 0x1a2   : > { %467 = vpow2.f32 %v273_v12 }
 0x1af   : > { %v468_v13 = vpop.eup %467 }
 0x1b0   : > { %275 = vadd.xlane.f32.xlu0 %v468_v13 }
 0x239   : > { %v276_v14 = vpop.xlane.xlu0 %275 }
 0x23a   : > { %469 = vlog2.f32 %v276_v14 }
 0x247   : > { %v470_v15 = vpop.eup %469 }
 0x248   : > { %v278_v16 = vmul.f32 0.6931472, %v470_v15 }
 0x24a   : > { %v279_v17 = vsub.f32 %v272_v11, %v278_v16 }
 0x24c   : > { %280 = vst [vmem:[%s200_s23] sm:$0xff] %v279_v17 }
 0x24d   : > { %538 = shalt.err (!%p535_p0)
}
 0x24e   : > { %s539_s10 = scalar_lea.hbm %s293_s30, 128  ;;  %s543_s26 = scalar_lea.hbm %s783_s3, 256 }
 0x24f   : > { %p540_p5 = scmp.ne.s32.totalorder %s293_s30, %s539_s10  ;;  %p544_p1 = scmp.lt.s32.totalorder %s293_s30, %s783_s3 }
 0x250   : > { %p545_p4 = scmp.lt.s32.totalorder %s543_s26, %s539_s10 }
 0x251   : > { %p541_p9 = pnand %p540_p5, %p799_p3 }
 0x252   : > { %p546_p6 = por %p545_p4, %p544_p1 }
 0x253   : > { %p542_p12 = pneg %p541_p9 }
 0x255   : > { %p547_p8 = pnand %p546_p6, %p542_p12 }
 0x257   : > { %550 = shalt.err (!%p547_p8)
}
 0x258   : > { %410 = dma.vmem_to_hbm [thread:$0]  (%p799_p3), %s296_s25, 128, %s293_s30, %s282_s4  }
 0x259 PF: > { %s307_s20 = sand.u32 1, %s581_s12   ;;  %p800_p11 = scmp.ne.s32.totalorder %s789_s19, 0 }
 0x25a   : > { %p801_p7 = scmp.ge.s32.totalorder %s593_s15, 2  ;;  %s308_s17 = scalar_lea.sflag [#allocation4], %s307_s20 }
 0x25c   : > { %p421_p10 = pnand %p801_p7, %p800_p11 }
 0x25e   : > { %p422_p2 = pneg %p421_p10 }
 0x260   : > { %576 = dma.done.wait (%p422_p2), %s308_s17, 128  }
 0x261   : > { %578 = vsyncadd (%p422_p2), %s308_s17, 4294967168  ;;  %p17_p13 = scmp.ge.s32.totalorder %s676_s24, 4   ;;  %s802_s12 = smov %s585_s13 }
 0x262   : > { %s803_s13 = smov %s589_s14  ;;  %s804_s14 = smov %s693_s5 }
 0x263   : > { %s805_s15 = smov %s676_s24  ;;  %19 = sbr.rel (!%p17_p13) target bundleno = 6 (0x6), region = 81 }
 0x268   :  { %313 = vsyncpa [#allocation3], 1 }
 0x269   :  { %315 = vsyncpa [#allocation3 + $0x1], 1 }
 0x26a   :  { %316 = vsyncpa [#allocation6], 1 }
 0x26b   :  { %317 = vsyncpa [#allocation4], 1 }
 0x26c   :  { %319 = vsyncpa [#allocation4 + $0x1], 1 }

</bundles_post_ra>
